<compile_context>
chip_gen: v5e
topology: v5e:2x2
jax: 0.10.0
libtpu: 0.0.40
codegen_flags: <defaults>
</compile_context>

<pallas_src>
import functools

import jax
import jax.numpy as jnp
from jax import lax
from jax.experimental import pallas as pl
from jax.experimental.pallas import tpu as pltpu

# Finite "-inf" so the online-softmax max / rescale math never produces inf-inf.
_NEG = -1e30


def _round_up(x, m):
    return ((x + m - 1) // m) * m


def _tile(dim, prefs):
    """Largest preferred tile that evenly divides `dim`, else the full dim
    (a full-dim block always satisfies the (8,128) block constraint)."""
    for p in prefs:
        if dim % p == 0:
            return p
    return dim


# ----------------------------------------------------------------------------
# Kernel 1: tiled linear  y = x @ W + b   (optionally + residual)
# grid = (M/tm, N/tn, K/tk), reduction axis last.
# bf16 MXU operands, f32 accumulation.
# ----------------------------------------------------------------------------
def _linear_bf16out_kernel(x_ref, w_ref, b_ref, o_ref, acc_ref):
    """Narrow (bf16) output: accumulate in an f32 VMEM scratch, cast at the end."""
    @pl.when(pl.program_id(2) == 0)
    def _init():
        acc_ref[...] = jnp.zeros_like(acc_ref)

    acc_ref[...] += jnp.dot(x_ref[...].astype(jnp.bfloat16),
                            w_ref[...].astype(jnp.bfloat16),
                            preferred_element_type=jnp.float32)

    @pl.when(pl.program_id(2) == pl.num_programs(2) - 1)
    def _finalize():
        o_ref[...] = (acc_ref[...] + b_ref[...]).astype(o_ref.dtype)


def _linear_f32out_kernel(x_ref, w_ref, b_ref, o_ref):
    """f32 output: accumulate directly into the resident output block (no scratch)."""
    @pl.when(pl.program_id(2) == 0)
    def _init():
        o_ref[...] = jnp.broadcast_to(b_ref[...], o_ref.shape)

    o_ref[...] += jnp.dot(x_ref[...].astype(jnp.bfloat16),
                          w_ref[...].astype(jnp.bfloat16),
                          preferred_element_type=jnp.float32)


def _linear_f32out_res_kernel(x_ref, w_ref, b_ref, r_ref, o_ref):
    """f32 output with fused bias + residual in the init step."""
    @pl.when(pl.program_id(2) == 0)
    def _init():
        o_ref[...] = b_ref[...] + r_ref[...]

    o_ref[...] += jnp.dot(x_ref[...].astype(jnp.bfloat16),
                          w_ref[...].astype(jnp.bfloat16),
                          preferred_element_type=jnp.float32)


def linear(x2d, w, b, residual=None, out_dtype=jnp.float32):
    """y = x2d @ w + b (+ residual).  x2d:(M,K)  w:(K,N) [bf16 ok]  b:(1,N) f32."""
    M, K = x2d.shape
    _, N = w.shape

    # Pad M up so large problems never fall back to a full-M block (VMEM blow-up).
    Mp = _round_up(M, 128) if M > 128 else _round_up(M, 8)
    tm = _tile(Mp, (256, 128))
    if Mp != M:
        x2d = jnp.pad(x2d, ((0, Mp - M), (0, 0)))
        if residual is not None:
            residual = jnp.pad(residual, ((0, Mp - M), (0, 0)))

    tn = _tile(N, (512, 256, 128))
    tk = _tile(K, (1024, 512, 256, 128))
    grid = (Mp // tm, N // tn, K // tk)

    in_specs = [
        pl.BlockSpec((tm, tk), lambda mi, ni, ki: (mi, ki)),
        pl.BlockSpec((tk, tn), lambda mi, ni, ki: (ki, ni)),
        pl.BlockSpec((1, tn), lambda mi, ni, ki: (0, ni)),
    ]
    operands = [x2d, w, b]
    scratch = []

    if out_dtype == jnp.float32:
        if residual is not None:
            in_specs.append(pl.BlockSpec((tm, tn), lambda mi, ni, ki: (mi, ni)))
            operands.append(residual)
            kernel = _linear_f32out_res_kernel
        else:
            kernel = _linear_f32out_kernel
    else:
        assert residual is None, "residual fusion only supported for f32 outputs"
        kernel = _linear_bf16out_kernel
        scratch = [pltpu.VMEM((tm, tn), jnp.float32)]

    out = pl.pallas_call(
        kernel,
        out_shape=jax.ShapeDtypeStruct((Mp, N), out_dtype),
        grid=grid,
        in_specs=in_specs,
        out_specs=pl.BlockSpec((tm, tn), lambda mi, ni, ki: (mi, ni)),
        scratch_shapes=scratch,
        compiler_params=pltpu.CompilerParams(
            dimension_semantics=("parallel", "parallel", "arbitrary")),
    )(*operands)
    return out[:M] if Mp != M else out


# ----------------------------------------------------------------------------
# Kernel 2: flash-style attention core.
# grid = (B, Lq/tq, Lk/tkv); ALL heads per step; online softmax carried in VMEM.
#   q_ref:(tq,E) bf16  k_ref/v_ref:(tkv,E) bf16  m_ref:(tq,tkv) int8  o_ref:(tq,E)
#   m_scr/l_scr:(H,tq,1) f32   acc_scr:(tq,E) f32
# 1/scale is already folded into Wq, so no per-step q rescale.
# ----------------------------------------------------------------------------
def _attn_kernel(q_ref, k_ref, v_ref, m_ref, o_ref, m_scr, l_scr, acc_scr, *,
                 num_heads, head_dim):
    ki = pl.program_id(2)

    @pl.when(ki == 0)
    def _init():
        m_scr[...] = jnp.full_like(m_scr, _NEG)
        l_scr[...] = jnp.zeros_like(l_scr)
        acc_scr[...] = jnp.zeros_like(acc_scr)

    masked = m_ref[...] != 0            # nonzero == masked (masked_fill semantics)
    q = q_ref[...]                      # (tq, E)  bf16
    k = k_ref[...]                      # (tkv, E) bf16
    v = v_ref[...]

    for h in range(num_heads):          # static unroll: all heads in one grid step
        lo = h * head_dim
        q_h = q[:, lo:lo + head_dim]    # (tq, Dh)
        k_h = k[:, lo:lo + head_dim]    # (tkv, Dh)
        v_h = v[:, lo:lo + head_dim]    # (tkv, Dh)

        # q @ k^T contracting last dims (no materialized transpose), f32 acc.
        s = lax.dot_general(q_h, k_h, (((1,), (1,)), ((), ())),
                            preferred_element_type=jnp.float32)      # (tq, tkv)
        s = jnp.where(masked, _NEG, s)

        m_prev = m_scr[h]                                            # (tq, 1)
        m_new = jnp.maximum(m_prev, jnp.max(s, axis=-1, keepdims=True))
        alpha = jnp.exp(m_prev - m_new)                              # rescale old
        p = jnp.exp(s - m_new)
        p = jnp.where(masked, 0.0, p)   # exact zero even for fully-masked tiles

        l_scr[h] = alpha * l_scr[h] + jnp.sum(p, axis=-1, keepdims=True)
        acc_scr[:, lo:lo + head_dim] = (
            alpha * acc_scr[:, lo:lo + head_dim]
            + jnp.dot(p.astype(jnp.bfloat16), v_h,
                      preferred_element_type=jnp.float32))
        m_scr[h] = m_new

    @pl.when(ki == pl.num_programs(2) - 1)
    def _finalize():
        # Fully-masked rows give l==0 -> NaN output, matching the torch reference.
        for h in range(num_heads):
            lo = h * head_dim
            inv_l = pl.reciprocal(l_scr[h], approx=True)
            acc_scr[:, lo:lo + head_dim] = acc_scr[:, lo:lo + head_dim] * inv_l
        o_ref[...] = acc_scr[...].astype(o_ref.dtype)   # single lane-dense store


def _attention(q_src, k_src, v_src, q_spec, k_spec, v_spec, mask_i8,
               B, Lq, Lk, E, num_heads, tq, tkv, out_dtype):
    head_dim = E // num_heads
    kern = functools.partial(_attn_kernel, num_heads=num_heads, head_dim=head_dim)
    return pl.pallas_call(
        kern,
        out_shape=jax.ShapeDtypeStruct((B, Lq, E), out_dtype),
        grid=(B, Lq // tq, Lk // tkv),          # KV (reduction) axis last
        in_specs=[q_spec, k_spec, v_spec,
                  pl.BlockSpec((None, tq, tkv), lambda b, qi, ki: (b, qi, ki))],
        out_specs=pl.BlockSpec((None, tq, E), lambda b, qi, ki: (b, qi, 0)),
        scratch_shapes=[pltpu.VMEM((num_heads, tq, 1), jnp.float32),   # running max
                        pltpu.VMEM((num_heads, tq, 1), jnp.float32),   # running sum
                        pltpu.VMEM((tq, E), jnp.float32)],             # running ctx
        compiler_params=pltpu.CompilerParams(
            dimension_semantics=("parallel", "parallel", "arbitrary")),
    )(q_src, k_src, v_src, mask_i8)


# ----------------------------------------------------------------------------
# One-time offline parameter prep: fold 1/scale into Wq/bq, cast weights to bf16
# (native MXU rate + half the weight HBM traffic), optionally concatenate fused
# QKV weights for the self-attention path.
# ----------------------------------------------------------------------------
def prepare_params(params, emb_size, num_of_heads, fuse_qkv):
    scale = (emb_size / num_of_heads) ** 0.5
    inv = 1.0 / scale
    wq = (params["wq"] * inv).astype(jnp.bfloat16)
    bq = params["bq"] * inv                          # biases stay f32
    wk = params["wk"].astype(jnp.bfloat16)
    wv = params["wv"].astype(jnp.bfloat16)

    fuse_qkv = fuse_qkv and (emb_size % 128 == 0)    # fused column slabs need lane alignment
    prepared = {
        "fused": fuse_qkv,
        "wo": params["wo"].astype(jnp.bfloat16),
        "bo": params["bo"],
    }
    if fuse_qkv:
        prepared["wqkv"] = jnp.concatenate([wq, wk, wv], axis=1)          # (E, 3E) bf16
        prepared["bqkv"] = jnp.concatenate([bq, params["bk"], params["bv"]], axis=1)
    else:
        prepared.update({"wq": wq, "bq": bq,
                         "wk": wk, "bk": params["bk"],
                         "wv": wv, "bv": params["bv"]})
    return prepared


# ----------------------------------------------------------------------------
# Full forward. Glue in plain JAX is reshapes only (free, row-major).
# ----------------------------------------------------------------------------
def multi_head_attention(prepared, input_q, input_k, input_v, input_mask,
                         emb_size, num_of_heads):
    B, Lq, E = input_q.shape
    Lk = input_k.shape[1]

    xq2 = input_q.reshape(B * Lq, E)
    mask_i8 = input_mask.astype(jnp.int8)          # 4x less HBM than int32 mask
    tq = _tile(Lq, (256, 128))
    tkv = _tile(Lk, (512, 256, 128))

    if prepared["fused"]:
        assert (input_k is input_q) and (input_v is input_q) and Lk == Lq, \
            "fused params require self-attention inputs"
        # Single (E, 3E) projection; attention reads Q/K/V column slabs straight
        # out of the fused bf16 output via BlockSpec column indexing.
        qkv = linear(xq2, prepared["wqkv"], prepared["bqkv"],
                     out_dtype=jnp.bfloat16).reshape(B, Lq, 3 * E)
        q_spec = pl.BlockSpec((None, tq, E), lambda b, qi, ki: (b, qi, 0))
        k_spec = pl.BlockSpec((None, tkv, E), lambda b, qi, ki: (b, ki, 1))
        v_spec = pl.BlockSpec((None, tkv, E), lambda b, qi, ki: (b, ki, 2))
        ctx = _attention(qkv, qkv, qkv, q_spec, k_spec, v_spec, mask_i8,
                         B, Lq, Lk, E, num_of_heads, tq, tkv, jnp.bfloat16)
    else:
        q3 = linear(xq2, prepared["wq"], prepared["bq"],
                    out_dtype=jnp.bfloat16).reshape(B, Lq, E)
        k3 = linear(input_k.reshape(B * Lk, E), prepared["wk"], prepared["bk"],
                    out_dtype=jnp.bfloat16).reshape(B, Lk, E)
        v3 = linear(input_v.reshape(B * Lk, E), prepared["wv"], prepared["bv"],
                    out_dtype=jnp.bfloat16).reshape(B, Lk, E)
        q_spec = pl.BlockSpec((None, tq, E), lambda b, qi, ki: (b, qi, 0))
        k_spec = pl.BlockSpec((None, tkv, E), lambda b, qi, ki: (b, ki, 0))
        v_spec = pl.BlockSpec((None, tkv, E), lambda b, qi, ki: (b, ki, 0))
        ctx = _attention(q3, k3, v3, q_spec, k_spec, v_spec, mask_i8,
                         B, Lq, Lk, E, num_of_heads, tq, tkv, jnp.bfloat16)

    # Output projection with fused bias + residual (no separate residual pass).
    out = linear(ctx.reshape(B * Lq, E), prepared["wo"], prepared["bo"],
                 residual=xq2, out_dtype=jnp.float32)
    return out.reshape(B, Lq, E)


# ----------------------------------------------------------------------------
# Pure-JAX f32 reference (torch semantics) for correctness checks.
# ----------------------------------------------------------------------------
def reference(params, input_q, input_k, input_v, input_mask, emb_size, num_of_heads):
    B, Lq, E = input_q.shape
    Lk = input_k.shape[1]
    Dh = E // num_of_heads
    scale = (emb_size / num_of_heads) ** 0.5
    q = (input_q @ params["wq"] + params["bq"][0]).reshape(B, Lq, num_of_heads, Dh).transpose(0, 2, 1, 3)
    k = (input_k @ params["wk"] + params["bk"][0]).reshape(B, Lk, num_of_heads, Dh).transpose(0, 2, 1, 3)
    v = (input_v @ params["wv"] + params["bv"][0]).reshape(B, Lk, num_of_heads, Dh).transpose(0, 2, 1, 3)
    s = jnp.einsum("bhqd,bhkd->bhqk", q, k) / scale
    s = jnp.where(input_mask[:, None, :, :], -jnp.inf, s)
    p = jax.nn.softmax(s, axis=-1)
    ctx = jnp.einsum("bhqk,bhkd->bhqd", p, v).transpose(0, 2, 1, 3).reshape(B, Lq, E)
    return ctx @ params["wo"] + params["bo"][0] + input_q


if __name__ == "__main__":
    key = jax.random.PRNGKey(0)

    def make_params(k, E):
        bound = (3.0 / E) ** 0.5        # matches init_parameters()
        ks = jax.random.split(k, 8)
        u = lambda kk, s: jax.random.uniform(kk, s, jnp.float32, -bound, bound)
        # Linear weights stored as (in, out) == torch W.T so that y = x @ W + b.
        return {
            "wq": u(ks[0], (E, E)), "bq": u(ks[1], (1, E)),
            "wk": u(ks[2], (E, E)), "bk": u(ks[3], (1, E)),
            "wv": u(ks[4], (E, E)), "bv": u(ks[5], (1, E)),
            "wo": u(ks[6], (E, E)), "bo": u(ks[7], (1, E)),
        }

    k0, k1, k2, k3, k4, k5, k6 = jax.random.split(key, 7)
    # Tolerances reflect bf16 MXU operands (f32 accumulation) vs. the f32 reference.
    ATOL = RTOL = 5e-2

    # --- Case 1: self-attention, causal mask (fused-QKV path, E % 128 == 0) ---
    B, L, E, H = 2, 8, 128, 4
    params1 = make_params(k0, E)
    prep1 = prepare_params(params1, E, H, fuse_qkv=True)
    x = jax.random.normal(k1, (B, L, E), jnp.float32)
    causal = jnp.arange(L)[None, :] > jnp.arange(L)[:, None]   # True == masked
    mask1 = jnp.broadcast_to(causal, (B, L, L))
    out1 = jax.block_until_ready(multi_head_attention(prep1, x, x, x, mask1, E, H))
    ref1 = reference(params1, x, x, x, mask1, E, H)
    assert out1.shape == (B, L, E)
    assert jnp.allclose(out1, ref1, atol=ATOL, rtol=RTOL), "self-attention mismatch"

    # --- Case 2: cross-attention, distinct inputs, Lq != Lk (general path) ---
    B2, Lq, Lk, E2, H2 = 2, 8, 16, 64, 4
    params2 = make_params(k2, E2)
    prep2 = prepare_params(params2, E2, H2, fuse_qkv=False)
    iq = jax.random.normal(k3, (B2, Lq, E2), jnp.float32)
    ik = jax.random.normal(k4, (B2, Lk, E2), jnp.float32)
    iv = jax.random.normal(k5, (B2, Lk, E2), jnp.float32)
    mask2 = jax.random.bernoulli(k6, 0.25, (B2, Lq, Lk))
    mask2 = mask2.at[:, :, 0].set(False)    # guard against fully-masked rows (NaN)
    out2 = jax.block_until_ready(
        multi_head_attention(prep2, iq, ik, iv, mask2, E2, H2))
    ref2 = reference(params2, iq, ik, iv, mask2, E2, H2)
    assert out2.shape == (B2, Lq, E2)
    assert jnp.allclose(out2, ref2, atol=ATOL, rtol=RTOL), "cross-attention mismatch"

    print("KERNEL_OK")
</pallas_src>

<mosaic_0001>
module attributes {stable_mosaic.version = 11 : i64} {
  func.func @_linear_bf16out_kernel(%arg0: i32, %arg1: i32, %arg2: i32, %arg3: memref<16x128xf32, #tpu.memory_space<vmem>>, %arg4: memref<128x128xbf16, #tpu.memory_space<vmem>>, %arg5: memref<1x128xf32, #tpu.memory_space<vmem>>, %arg6: memref<16x128xbf16, #tpu.memory_space<vmem>>, %arg7: memref<16x128xf32, #tpu.memory_space<vmem>>) attributes {dimension_semantics = [#tpu.dimension_semantics<parallel>, #tpu.dimension_semantics<parallel>, #tpu.dimension_semantics<arbitrary>], iteration_bounds = array<i64: 1, 3, 1>, scalar_prefetch = 0 : i64, scratch_operands = 1 : i64, tpu.core_type = #tpu.core_type<tc>, window_params = [{transform_indices = @transform_0, window_bounds = array<i64: 16, 128>}, {transform_indices = @transform_1, window_bounds = array<i64: 128, 128>}, {transform_indices = @transform_2, window_bounds = array<i64: 1, 128>}, {transform_indices = @transform_3, window_bounds = array<i64: 16, 128>}]} {
    %c0_i32 = arith.constant 0 : i32
    %0 = arith.cmpi eq, %arg2, %c0_i32 : i32
    %1 = arith.extui %0 : i1 to i32
    %c0_i32_0 = arith.constant 0 : i32
    %2 = arith.cmpi ne, %1, %c0_i32_0 : i32
    scf.if %2 {
      %cst_10 = arith.constant 0.000000e+00 : f32
      %13 = vector.broadcast %cst_10 : f32 to vector<16x128xf32>
      %c0_11 = arith.constant 0 : index
      %c0_12 = arith.constant 0 : index
      %14 = vector.load %arg7[%c0_11, %c0_12] : memref<16x128xf32, #tpu.memory_space<vmem>>, vector<16x128xf32>
      tpu.vector_store %arg7[%c0_11, %c0_12], %13 {strides = array<i32>} : memref<16x128xf32, #tpu.memory_space<vmem>>, vector<16x128xf32>,
    } else {
    }
    %c0 = arith.constant 0 : index
    %c0_1 = arith.constant 0 : index
    %3 = vector.load %arg7[%c0, %c0_1] : memref<16x128xf32, #tpu.memory_space<vmem>>, vector<16x128xf32>
    %c0_2 = arith.constant 0 : index
    %c0_3 = arith.constant 0 : index
    %4 = vector.load %arg3[%c0_2, %c0_3] : memref<16x128xf32, #tpu.memory_space<vmem>>, vector<16x128xf32>
    %5 = arith.truncf %4 : vector<16x128xf32> to vector<16x128xbf16>
    %c0_4 = arith.constant 0 : index
    %c0_5 = arith.constant 0 : index
    %6 = vector.load %arg4[%c0_4, %c0_5] : memref<128x128xbf16, #tpu.memory_space<vmem>>, vector<128x128xbf16>
    %cst = arith.constant dense<0.000000e+00> : vector<16x128xf32>
    %7 = tpu.matmul %5, %6, %cst {dimension_numbers = #tpu.dot_dimension_numbers<[1], [0], [0], [1], [0, 0, 1, 1], [], []>} : vector<16x128xbf16>, vector<128x128xbf16>, vector<16x128xf32> -> vector<16x128xf32>
    %8 = arith.addf %3, %7 : vector<16x128xf32>
    %c0_6 = arith.constant 0 : index
    %c0_7 = arith.constant 0 : index
    %9 = vector.load %arg7[%c0_6, %c0_7] : memref<16x128xf32, #tpu.memory_space<vmem>>, vector<16x128xf32>
    tpu.vector_store %arg7[%c0_6, %c0_7], %8 {strides = array<i32>} : memref<16x128xf32, #tpu.memory_space<vmem>>, vector<16x128xf32>,
    %c0_i32_8 = arith.constant 0 : i32
    %10 = arith.cmpi eq, %arg2, %c0_i32_8 : i32
    %11 = arith.extui %10 : i1 to i32
    %c0_i32_9 = arith.constant 0 : i32
    %12 = arith.cmpi ne, %11, %c0_i32_9 : i32
    scf.if %12 {
      %c0_10 = arith.constant 0 : index
      %c0_11 = arith.constant 0 : index
      %13 = vector.load %arg7[%c0_10, %c0_11] : memref<16x128xf32, #tpu.memory_space<vmem>>, vector<16x128xf32>
      %c0_12 = arith.constant 0 : index
      %c0_13 = arith.constant 0 : index
      %14 = vector.load %arg5[%c0_12, %c0_13] : memref<1x128xf32, #tpu.memory_space<vmem>>, vector<1x128xf32>
      %15 = vector.broadcast %14 : vector<1x128xf32> to vector<16x128xf32>
      %16 = arith.addf %13, %15 : vector<16x128xf32>
      %17 = arith.truncf %16 : vector<16x128xf32> to vector<16x128xbf16>
      %c0_14 = arith.constant 0 : index
      %c0_15 = arith.constant 0 : index
      %18 = vector.load %arg6[%c0_14, %c0_15] : memref<16x128xbf16, #tpu.memory_space<vmem>>, vector<16x128xbf16>
      tpu.vector_store %arg6[%c0_14, %c0_15], %17 {strides = array<i32>} : memref<16x128xbf16, #tpu.memory_space<vmem>>, vector<16x128xbf16>,
    } else {
    }
    return
  }
  func.func @transform_0(%arg0: i32, %arg1: i32, %arg2: i32) -> (i32, i32) {
    %c0_i32 = arith.constant 0 : i32
    return %arg0, %arg2 : i32, i32
  }
  func.func @transform_1(%arg0: i32, %arg1: i32, %arg2: i32) -> (i32, i32) {
    %c0_i32 = arith.constant 0 : i32
    return %arg2, %arg1 : i32, i32
  }
  func.func @transform_2(%arg0: i32, %arg1: i32, %arg2: i32) -> (i32, i32) {
    %c0_i32 = arith.constant 0 : i32
    %c0_i32_0 = arith.constant 0 : i32
    return %c0_i32, %arg1 : i32, i32
  }
  func.func @transform_3(%arg0: i32, %arg1: i32, %arg2: i32) -> (i32, i32) {
    %c0_i32 = arith.constant 0 : i32
    return %arg0, %arg1 : i32, i32
  }
}

</mosaic_0001>

<bundles_post_ra>
// kernel: tpu_custom_call.1
= control target key start
LH: loop header
LB: loop body
LE: loop exit
PB: predicated region body
PF: predicated region fallthrough
CT: control target
= control target key end

     0   :  { %8 = vsyncpa [#allocation4], 0  ;;  %s1051_s0 = inlined_call_operand.hbm [shape: f32[16,128], index: 0, kind: input, shape index: {}]   ;;  %s1052_s1 = inlined_call_operand.hbm [shape: bf16[128,384], index: 1, kind: input, shape index: {}]   ;;  %s1053_s2 = inlined_call_operand.hbm [shape: f32[1,384], index: 2, kind: input, shape index: {}]   ;;  %s1054_s3 = inlined_call_operand.hbm [shape: bf16[16,384], index: 3, kind: output, shape index: {}]  }
   0x1   :  { %9 = vsyncpa [#allocation7], 0 }
   0x2   :  { %11 = vsyncpa [#allocation7 + $0x1], 0 }
   0x3   :  { %12 = vsyncpa [#allocation5], 0 }
   0x4   :  { %14 = vsyncpa [#allocation5 + $0x1], 0  ;;  %s879_s12 = smov 0   ;;  %s881_s13 = smov 0  }
   0x5   :  { %s883_s14 = smov 0   ;;  %s885_s15 = smov 0  }
   0x6   :  { %s887_s16 = smov 0   ;;  %s889_s17 = smov 0  }
   0x7 LB: > { %s35_s18 = sadd.s32 1, %s844_s16  ;;  %s76_s19 = sadd.s32 1, %s836_s14  ;;  %s848_s17 = sphi %s889_s17, %s20_s17   ;;  %s844_s16 = sphi %s887_s16, %s1065_s16   ;;  %s840_s15 = sphi %s885_s15, %s1064_s15   ;;  %s836_s14 = sphi %s883_s14, %s1063_s14   ;;  %s832_s13 = sphi %s881_s13, %s1062_s13   ;;  %s828_s12 = sphi %s879_s12, %s1061_s12  }
   0x8   : > { %p37_p0 = scmp.ge.s32.totalorder %s35_s18, 3  ;;  %p83_p1 = scmp.ne.s32.totalorder %s836_s14, %s832_s13 }
   0x9   : > { %p84_p2 = scmp.eq.s32.totalorder %s848_s17, 0  ;;  %p611_p4 = scmp.lt.s32.totalorder %s848_s17, 3 }
   0xa   : > { %s1067_s18 = smov (%p37_p0, %s35_s18), 0  ;;  %s185_s22 = sand.u32 1, %s848_s17  }
   0xb   : > { %p919_p3 = por %p84_p2, %p83_p1  ;;  %s72_s21 = ssub.s32 %s844_s16, %s1067_s18 }
   0xc   : > { %p74_p5 = scmp.eq.s32.totalorder %s72_s21, 0  ;;  %s187_s23 = sand.u32 1, %s836_s14  }
   0xd   : > { %s531_s24 = sshll.u32 %s844_s16, 2  ;;  %s530_s26 = sshll.u32 %s187_s23, 6 }
   0xe   : > { %s930_s25 = scalar_select %p74_p5, %s836_s14, %s76_s19  }
   0xf   : > { %s196_s29 = scalar_lea.hbm %s1052_s1, %s531_s24  ;;  %s189_s4 = scalar_lea.vmem [#allocation6], %s530_s26 }
  0x10   : > { %s197_s30 = sshll.u32 %s196_s29, 4  ;;  %s199_s5 = sshll.u32 %s189_s4, 4  ;;  %s198_s30 = int_to_ptr.hbm [resolvable:$true] %s197_s30  ;;  %s200_s5 = int_to_ptr.vmem [resolvable:$true] %s199_s5 }
  0x11   : > { %p941_p6 = pnand %p611_p4, %p919_p3  ;;  %s945_s7 = scalar_lea.sflag [#allocation7], %s185_s22 }
  0x12   : > { %s850_s8 = smov 192   ;;  %s851_s9 = smov 64  }
  0x13   : > { %s852_s10 = smov 4   ;;  %s951_s11 = sadd.s32 4294967295, %s848_s17  }
  0x14   : > { %602 = dma.hbm_to_vmem [thread:$0]  (!%p941_p6), %s198_s30, 1024, %s200_s5, %s945_s7, %s850_s8, %s851_s9, %s852_s10  }
  0x15   : > { %s526_s19 = sadd.s32 4294967294, %s848_s17   ;;  %p89_p7 = scmp.ne.s32.totalorder %s832_s13, %s828_s12 }
  0x16   : > { %p90_p8 = scmp.eq.s32.totalorder %s951_s11, 0  ;;  %p141_p9 = scmp.eq.s32.totalorder %s951_s11, 2 }
  0x17   : > { %p147_p10 = scmp.eq.s32.totalorder %s526_s19, 2  ;;  %p527_p12 = scmp.ge.s32.totalorder %s848_s17, 1 }
  0x18   : > { %p960_p11 = por %p90_p8, %p89_p7  ;;  %p968_p13 = por %p141_p9, %p83_p1 }
  0x19   : > { %p972_p0 = por %p147_p10, %p89_p7  ;;  %p154_p2 = scmp.lt.s32.totalorder %s848_s17, 4 }
  0x1a   : > { %s169_s27 = sshll.u32 %s1051_s0, 4  ;;  %s853_s29 = smov [#allocation3]   ;;  %s170_s27 = int_to_ptr.hbm [resolvable:$true] %s169_s27 }
  0x1b   : > { %p980_p3 = pnand %p527_p12, %p154_p2  ;;  %s171_s30 = sshll.u32 %s853_s29, 4  ;;  %s172_s30 = int_to_ptr.vmem [resolvable:$true] %s171_s30 }
  0x1c   : > { %s215_s8 = scalar_lea.hbm %s1053_s2, %s844_s16  ;;  %s212_s10 = scalar_lea.vmem [#allocation8], %s187_s23 }
  0x1d   : > { %p595_p1 = pneg %p980_p3  ;;  %s217_s9 = sshll.u32 %s215_s8, 4  ;;  %s218_s9 = int_to_ptr.hbm [resolvable:$true] %s217_s9 }
  0x1e   : > { %s219_s19 = sshll.u32 %s212_s10, 4  ;;  %s854_s24 = smov 128   ;;  %s220_s19 = int_to_ptr.vmem [resolvable:$true] %s219_s19 }
  0x1f   : > { %p596_p4 = pnand %p595_p1, %p90_p8  ;;  %s855_s26 = smov 8  }
  0x20   : > { %605 = dma.hbm_to_vmem [thread:$0]  (!%p941_p6), %s218_s9, 16, %s220_s19, %s945_s7  }
  0x21   : > { %598 = dma.hbm_to_vmem [thread:$0]  (!%p596_p4), %s170_s27, 256, %s172_s30, [#allocation4], %s854_s24, %s854_s24, %s855_s26  }
  0x22   : > { %228 = sbr.rel (%p980_p3) target bundleno = 219 (0xdb), region = 32 }
  0x27   : > { %815 = dma.done.wait (%p90_p8), [#allocation4], 256  }
  0x28   : > { %817 = vsyncadd (%p90_p8), [#allocation4], 4294967040  ;;  %s235_s23 = sand.u32 1, %s951_s11   ;;  %s1005_s29 = sand.u32 1, %s832_s13  }
  0x29   : > { %s534_s27 = sshll.u32 %s1005_s29, 6  ;;  %s236_s30 = scalar_lea.sflag [#allocation7], %s235_s23 }
  0x2a   : > { %s239_s6 = scalar_lea.vmem [#allocation6], %s534_s27 }
  0x2b   : > { %819 = dma.done.wait (%p960_p11), %s236_s30, 1040  }
  0x2c   : > { %821 = vsyncadd (%p960_p11), %s236_s30, 4294966256  ;;  %v579_v0 = vld [vmem:[%s239_s6 + $0x38] sm:$0xff]  ;;  %v578_v1 = vld [vmem:[%s239_s6 + $0x30] sm:$0xff]  ;;  %s248_s7 = scalar_lea.vmem [#allocation8], %s1005_s29  ;;  %s535_s11 = sshll.u32 %s1005_s29, 3 }
  0x2d   : > { %354 = vmatpush.bf16.msra.mxu0 %v579_v0  ;;  %v577_v2 = vld [vmem:[%s239_s6 + $0x28] sm:$0xff]  ;;  %v576_v3 = vld [vmem:[%s239_s6 + $0x20] sm:$0xff]  ;;  %v575_v4 = vld [vmem:[%s239_s6 + $0x18] sm:$0xff]  ;;  %s569_s20 = sshll.u32 %s840_s15, 2  ;;  %s275_s8 = scalar_lea.vmem [#allocation9], %s535_s11 }
  0x2e   : > { %v574_v5 = vld [vmem:[%s239_s6 + $0x10] sm:$0xff]  ;;  %v573_v6 = vld [vmem:[%s239_s6 + $0x8] sm:$0xff]  ;;  %v572_v7 = vld [vmem:[%s239_s6] sm:$0xff]  ;;  %s401_s5 = scalar_lea.hbm %s1054_s3, %s569_s20  ;;  %s402_s9 = sshll.u32 %s275_s8, 4  ;;  %s403_s9 = int_to_ptr.vmem [resolvable:$true] %s402_s9 }
  0x2f   : > { %v287_v8 = vld [vmem:[#allocation3] sm:$0xff]  ;;  %v288_v9 = vld [vmem:[#allocation3 + $0x8] sm:$0xff]  ;;  %s404_s10 = sshll.u32 %s401_s5, 4  ;;  %s388_s19 = scalar_lea.sflag [#allocation5], %s1005_s29  ;;  %s405_s10 = int_to_ptr.hbm [resolvable:$true] %s404_s10 }
  0x30   : > { %v289_v10 = vpack.c.bf16 %v288_v9, %v287_v8  ;;  %v671_v12 = vld [vmem:[%s248_s7] ss:$0 sm:$0xff]  ;;  %s776_s24 = sshra.s32 %s405_s10, 4  ;;  %s782_s27 = scalar_lea.hbm %s1054_s3, 24  ;;  %s777_s24 = int_to_ptr.hbm [resolvable:$true] %s776_s24 }
  0x31   : > { %355 = vmatpush.bf16.msra.mxu0 %v578_v1  ;;  %s778_s15 = scalar_lea.hbm %s777_s24, 8  ;;  %p783_p8 = scmp.lt.s32.totalorder %s777_s24, %s1054_s3 }
  0x32   : > { %p779_p5 = scmp.ne.s32.totalorder %s777_s24, %s778_s15  ;;  %p784_p9 = scmp.lt.s32.totalorder %s782_s27, %s778_s15 }
  0x34   : > { %p780_p6 = pnand %p779_p5, %p968_p13  ;;  %p785_p10 = por %p784_p9, %p783_p8 }
  0x35   : > { %356 = vmatpush.bf16.msra.mxu0 %v577_v2 }
  0x36   : > { %p781_p7 = pneg %p780_p6 }
  0x38   : > { %p786_p11 = pnand %p785_p10, %p781_p7 }
  0x39   : > { %357 = vmatpush.bf16.msra.mxu0 %v576_v3 }
  0x3d   : > { %358 = vmatpush.bf16.msra.mxu0 %v575_v4 }
  0x41   : > { %359 = vmatpush.bf16.msra.mxu0 %v574_v5 }
  0x45   : > { %360 = vmatpush.bf16.msra.mxu0 %v573_v6 }
  0x49   : > { %361 = vmatpush.bf16.msra.mxu0 %v572_v7 }
  0x4c   : > { %362 = vmatmul.bf16.vlgmr.msra.gmra.mxu0 %v289_v10 }
  0xc9   : > { %v363_v11 = vpop.f32.mrf.mxu0 }
  0xca   : > { %v381_v14 = vadd.f32 %v671_v12, %v363_v11 }
  0xd1   : > { %v365_v13 = vpop.f32.mrf.mxu0 }
  0xd2   : > { %v382_v15 = vadd.f32 %v671_v12, %v365_v13 }
  0xd4   : > { %v583_v16 = vpack.c.bf16 %v382_v15, %v381_v14 }
  0xd6   : > { %584 = vst [vmem:[%s275_s8] sm:$0xff] %v583_v16  }
  0xd7   : > { %789 = shalt.err (!%p786_p11)
}
  0xd8   : > { %s856_s29 = smov 64   ;;  %s857_s7 = smov 192  }
  0xd9   : > { %s858_s11 = smov 4  }
  0xda   : > { %593 = dma.vmem_to_hbm [thread:$0]  (%p968_p13), %s403_s9, 128, %s405_s10, %s388_s19, %s856_s29, %s857_s7, %s858_s11  }
  0xdb PF: > { %p613_p12 = scmp.ge.s32.totalorder %s848_s17, 2  ;;  %s419_s20 = sand.u32 1, %s828_s12  }
  0xdc   : > { %s420_s28 = scalar_lea.sflag [#allocation5], %s419_s20 }
  0xdd   : > { %p607_p2 = pnand %p613_p12, %p972_p0 }
  0xdf   : > { %p608_p3 = pneg %p607_p2 }
  0xe1   : > { %823 = dma.done.wait (%p608_p3), %s420_s28, 128  }
  0xe2   : > { %825 = vsyncadd (%p608_p3), %s420_s28, 4294967168  ;;  %s20_s17 = sadd.s32 1, %s848_s17   ;;  %s1061_s12 = smov %s832_s13 }
  0xe3   : > { %p17_p1 = scmp.ge.s32.totalorder %s20_s17, 5   ;;  %s1062_s13 = smov %s836_s14 }
  0xe4   : > { %s1063_s14 = smov %s930_s25  ;;  %s1064_s15 = smov %s844_s16 }
  0xe5   : > { %s1065_s16 = smov %s1067_s18  ;;  %19 = sbr.rel (!%p17_p1) target bundleno = 7 (0x7), region = 102 }
  0xea   :  { %426 = vsyncpa [#allocation4], 1 }
  0xeb   :  { %428 = vsyncpa [#allocation4 + $0x1], 1 }
  0xec   :  { %429 = vsyncpa [#allocation7], 1 }
  0xed   :  { %431 = vsyncpa [#allocation7 + $0x1], 1 }
  0xee   :  { %432 = vsyncpa [#allocation5], 1 }
  0xef   :  { %434 = vsyncpa [#allocation5 + $0x1], 1 }

</bundles_post_ra>
